<compile_context>
chip_gen: v7x
topology: tpu7x:2x2x1
jax: 0.10.0
libtpu: 0.0.40
codegen_flags: <defaults>
</compile_context>

<pallas_src>
import jax
import jax.numpy as jnp
from jax.experimental import pallas as pl
from jax.experimental.pallas import tpu as pltpu

LANE = 128
BF16_SUBLANE = 16  # bf16 packs 16 sublanes per vreg


def _round_up(x, m):
    return (x + m - 1) // m * m


def _cdiv(a, b):
    return -(-a // b)


# ----------------------------- Pallas kernel ------------------------------- #

def plc_fused_kernel(x_ref, w_big_ref, b_feat_ref, w_cat_ref, b_cat_ref,
                     feat_ref, logits_ref, acc_ref):
    # grid = (batch tiles, K tiles); K = C*H*W is the contracted backbone dim.
    # x_ref:      [BM, TK]        bf16 batch/K tile (channel-major NCHW flatten)
    # w_big_ref:  [TK, F_pad]     bf16 backbone weight with 1/(H*W) GAP folded in
    # b_feat_ref: [1, F_pad]      f32
    # w_cat_ref:  [F_pad, NC_pad] bf16 all classifier heads concatenated
    # b_cat_ref:  [1, NC_pad]     f32
    # feat_ref:   [BM, F_pad]     f32 out
    # logits_ref: [BM, NC_pad]    f32 out
    # acc_ref:    [BM, F_pad]     f32 scratch accumulator
    k = pl.program_id(1)

    @pl.when(k == 0)
    def _init():
        acc_ref[...] = jnp.zeros_like(acc_ref)

    # bf16 operands, f32 accumulation on the MXU.
    acc_ref[...] += jnp.dot(x_ref[...], w_big_ref[...],
                            preferred_element_type=jnp.float32)

    @pl.when(k == pl.num_programs(1) - 1)
    def _finalize():
        feat = acc_ref[...] + b_feat_ref[...]          # f32 elementwise (v5e-safe)
        feat_ref[...] = feat
        logits_ref[...] = (
            jnp.dot(feat.astype(jnp.bfloat16), w_cat_ref[...],
                    preferred_element_type=jnp.float32)
            + b_cat_ref[...]
        )


# ------------------------- parameter preprocessing -------------------------- #

def prepare_plc_params(w_backbone, b_backbone, head_weights, head_biases,
                       spatial_size):
    """One-time preprocessing hoisted out of the forward path."""
    C, F = w_backbone.shape
    HW = spatial_size
    F_pad = _round_up(F, LANE)

    # Fold GAP (mean over H*W) into the backbone matmul; cast operand to bf16.
    w_big = jnp.repeat(w_backbone / HW, HW, axis=0)                  # [C*HW, F]
    w_big = jnp.pad(w_big, ((0, 0), (0, F_pad - F))).astype(jnp.bfloat16)
    b_feat = jnp.pad(b_backbone, (0, F_pad - F)).reshape(1, F_pad)
    b_feat = b_feat.astype(jnp.float32)

    # Fuse every classifier head into one matmul: y_i = feat @ W_i.T + b_i.
    w_cat = jnp.concatenate([w.T for w in head_weights], axis=1)     # [F, NC]
    b_cat = jnp.concatenate(head_biases, axis=0)                     # [NC]
    NC = w_cat.shape[1]
    NC_pad = _round_up(NC, LANE)
    w_cat = jnp.pad(w_cat, ((0, F_pad - F), (0, NC_pad - NC)))
    w_cat = w_cat.astype(jnp.bfloat16)
    b_cat = jnp.pad(b_cat, (0, NC_pad - NC)).reshape(1, NC_pad).astype(jnp.float32)

    return {"w_big": w_big, "b_feat": b_feat, "w_cat": w_cat, "b_cat": b_cat}


# ------------------------------ tile selection ------------------------------ #

def _vmem_estimate(bm, tk, f_pad, nc_pad):
    """Conservative (all double-buffered) per-core VMEM footprint in bytes."""
    x_bytes = 2 * bm * tk * 2                    # bf16 x tile, double-buffered
    wbig_bytes = 2 * tk * f_pad * 2              # bf16 backbone weight tile
    wcat_bytes = 2 * f_pad * nc_pad * 2          # bf16 fused head weight
    bias_bytes = 2 * (f_pad + nc_pad) * 4
    out_bytes = 2 * bm * (f_pad + nc_pad) * 4    # f32 feat + logits tiles
    acc_bytes = bm * f_pad * 4                   # f32 accumulator scratch
    return x_bytes + wbig_bytes + wcat_bytes + bias_bytes + out_bytes + acc_bytes


def _k_tile_candidates(chw):
    if chw % LANE != 0:
        return [chw]  # cannot K-tile cleanly; keep the whole reduction resident
    return [t for t in range(chw, 0, -LANE) if chw % t == 0]


def _choose_tiles(batch, chw, f_pad, nc_pad):
    # Per-chip batch-tile cap: ~64 MiB-VMEM parts (v7x-class) -> 256 rows,
    # 128 MiB parts (v5e/v6e) -> 512 rows.
    try:
        vmem_cap = pltpu.get_tpu_info().vmem_capacity_bytes
    except Exception:
        vmem_cap = 128 << 20
    bm_cap = 256 if vmem_cap <= (64 << 20) else 512

    budget = 20 << 20  # fits every chip's scoped-VMEM default with headroom

    b16 = _round_up(batch, BF16_SUBLANE)
    if b16 <= 2 * BF16_SUBLANE:
        bm = b16
    else:
        # Aim for >= 2 batch grid steps so v7x megacore sharding has work.
        bm = min(bm_cap, _round_up(_cdiv(b16, 2), BF16_SUBLANE))

    tks = _k_tile_candidates(chw)
    while True:
        for tk in tks:
            if _vmem_estimate(bm, tk, f_pad, nc_pad) <= budget:
                return bm, tk
        if bm <= BF16_SUBLANE:
            return BF16_SUBLANE, tks[-1]
        bm = max(BF16_SUBLANE, bm - BF16_SUBLANE)


# --------------------------------- forward ---------------------------------- #

def plc_forward(x_nchw, prepared, architecture, out_features):
    B, C, H, W = x_nchw.shape
    CHW = C * H * W
    F_pad = prepared["w_big"].shape[1]
    NC_pad = prepared["w_cat"].shape[1]

    BM, TK = _choose_tiles(B, CHW, F_pad, NC_pad)
    num_b = _cdiv(B, BM)
    num_k = _cdiv(CHW, TK)

    # bf16 MXU operand; no batch padding: cdiv grid + Pallas partial last block
    # (overhang rows are row-local garbage and are never returned).
    x2d = x_nchw.reshape(B, CHW).astype(jnp.bfloat16)

    vmem_limit = int(min(
        max(_vmem_estimate(BM, TK, F_pad, NC_pad) + (8 << 20), 16 << 20),
        40 << 20))

    def call(single_buffer_consts):
        def const_spec(shape):
            if single_buffer_consts:
                # Constant index_map -> fetch once, no double buffer.
                return pl.BlockSpec(shape, lambda i, k: (0, 0),
                                    pipeline_mode=pl.Buffered(1))
            return pl.BlockSpec(shape, lambda i, k: (0, 0))

        if num_k == 1:
            w_big_spec = const_spec((TK, F_pad))
        else:
            w_big_spec = pl.BlockSpec((TK, F_pad), lambda i, k: (k, 0))

        return pl.pallas_call(
            plc_fused_kernel,
            out_shape=(
                jax.ShapeDtypeStruct((B, F_pad), jnp.float32),
                jax.ShapeDtypeStruct((B, NC_pad), jnp.float32),
            ),
            grid_spec=pltpu.PrefetchScalarGridSpec(
                num_scalar_prefetch=0,
                grid=(num_b, num_k),
                in_specs=[
                    pl.BlockSpec((BM, TK), lambda i, k: (i, k)),   # x tile
                    w_big_spec,                                    # backbone W
                    const_spec((1, F_pad)),                        # backbone bias
                    const_spec((F_pad, NC_pad)),                   # fused head W
                    const_spec((1, NC_pad)),                       # fused head bias
                ],
                out_specs=(
                    pl.BlockSpec((BM, F_pad), lambda i, k: (i, 0)),
                    pl.BlockSpec((BM, NC_pad), lambda i, k: (i, 0)),
                ),
                scratch_shapes=[pltpu.VMEM((BM, F_pad), jnp.float32)],
            ),
            compiler_params=pltpu.CompilerParams(
                dimension_semantics=("parallel", "arbitrary"),
                vmem_limit_bytes=vmem_limit,
            ),
        )(x2d, prepared["w_big"], prepared["b_feat"],
          prepared["w_cat"], prepared["b_cat"])

    try:
        feat_pad, logits_pad = call(True)
    except Exception:
        # Single-buffering the constant weights is a VMEM-only optimization;
        # fall back to default double-buffering if pipeline_mode is unsupported.
        feat_pad, logits_pad = call(False)

    # Cheap un-padding / per-classifier split in plain JAX (lane-dense stores
    # stay inside the kernel).
    feat = feat_pad[:, :out_features]
    logits = []
    off = 0
    for nc in architecture:
        logits.append(logits_pad[:, off:off + nc])
        off += nc
    return logits, feat


# ----------------------------------- main ----------------------------------- #

if __name__ == "__main__":
    B, C, H, W = 2, 4, 16, 16
    out_features = 32
    architecture = [5, 7, 10]          # per-level class counts

    key = jax.random.PRNGKey(0)
    kx, kwb, kbb, *khead = jax.random.split(key, 3 + 2 * len(architecture))

    x = jax.random.normal(kx, (B, C, H, W), dtype=jnp.float32)

    # PyTorch Linear convention: W is [out, in], y = x @ W.T + b.
    w_backbone = jax.random.normal(kwb, (C, out_features), dtype=jnp.float32) * 0.1
    b_backbone = jax.random.normal(kbb, (out_features,), dtype=jnp.float32) * 0.1

    head_weights, head_biases = [], []
    for i, nc in enumerate(architecture):
        kw, kb = khead[2 * i], khead[2 * i + 1]
        head_weights.append(
            jax.random.normal(kw, (nc, out_features), dtype=jnp.float32) * 0.1)
        head_biases.append(
            jax.random.normal(kb, (nc,), dtype=jnp.float32) * 0.1)

    prepared = prepare_plc_params(
        w_backbone, b_backbone, head_weights, head_biases, spatial_size=H * W)

    logits, feat = plc_forward(x, prepared, architecture, out_features)
    jax.block_until_ready(feat)
    for l in logits:
        jax.block_until_ready(l)

    # Pure-JAX f32 reference (tolerance loosened for bf16 matmul operands).
    pooled_ref = jnp.mean(x.reshape(B, C, H * W), axis=-1)
    feat_ref = pooled_ref @ w_backbone + b_backbone
    assert feat.shape == (B, out_features)
    assert jnp.allclose(feat, feat_ref, atol=2e-2), "feature mismatch"
    for i, nc in enumerate(architecture):
        logit_ref = feat_ref @ head_weights[i].T + head_biases[i]
        assert logits[i].shape == (B, nc)
        assert jnp.allclose(logits[i], logit_ref, atol=2e-2), f"logit {i} mismatch"

    print("KERNEL_OK")
</pallas_src>

<mosaic_0001>
module attributes {stable_mosaic.version = 11 : i64} {
  func.func @plc_fused_kernel(%arg0: i32, %arg1: i32, %arg2: memref<16x1024xbf16, #tpu.memory_space<vmem>>, %arg3: memref<1024x128xbf16, #tpu.memory_space<vmem>>, %arg4: memref<1x128xf32, #tpu.memory_space<vmem>>, %arg5: memref<128x128xbf16, #tpu.memory_space<vmem>>, %arg6: memref<1x128xf32, #tpu.memory_space<vmem>>, %arg7: memref<16x128xf32, #tpu.memory_space<vmem>>, %arg8: memref<16x128xf32, #tpu.memory_space<vmem>>, %arg9: memref<16x128xf32, #tpu.memory_space<vmem>>) attributes {dimension_semantics = [#tpu.dimension_semantics<parallel>, #tpu.dimension_semantics<arbitrary>], iteration_bounds = array<i64: 1, 1>, scalar_prefetch = 0 : i64, scratch_operands = 1 : i64, tpu.core_type = #tpu.core_type<tc>, window_params = [{transform_indices = @transform_0, window_bounds = array<i64: 16, 1024>}, {pipeline_mode = #tpu.pipeline_mode<synchronous>, transform_indices = @transform_1, window_bounds = array<i64: 1024, 128>}, {pipeline_mode = #tpu.pipeline_mode<synchronous>, transform_indices = @transform_2, window_bounds = array<i64: 1, 128>}, {pipeline_mode = #tpu.pipeline_mode<synchronous>, transform_indices = @transform_3, window_bounds = array<i64: 128, 128>}, {pipeline_mode = #tpu.pipeline_mode<synchronous>, transform_indices = @transform_4, window_bounds = array<i64: 1, 128>}, {transform_indices = @transform_5, window_bounds = array<i64: 16, 128>}, {transform_indices = @transform_6, window_bounds = array<i64: 16, 128>}]} {
    %c0_i32 = arith.constant 0 : i32
    %0 = arith.cmpi eq, %arg1, %c0_i32 : i32
    %1 = arith.extui %0 : i1 to i32
    %c0_i32_0 = arith.constant 0 : i32
    %2 = arith.cmpi ne, %1, %c0_i32_0 : i32
    scf.if %2 {
      %cst_10 = arith.constant 0.000000e+00 : f32
      %12 = vector.broadcast %cst_10 : f32 to vector<16x128xf32>
      %c0_11 = arith.constant 0 : index
      %c0_12 = arith.constant 0 : index
      %13 = vector.load %arg9[%c0_11, %c0_12] : memref<16x128xf32, #tpu.memory_space<vmem>>, vector<16x128xf32>
      tpu.vector_store %arg9[%c0_11, %c0_12], %12 {strides = array<i32>} : memref<16x128xf32, #tpu.memory_space<vmem>>, vector<16x128xf32>,
    } else {
    }
    %c0 = arith.constant 0 : index
    %c0_1 = arith.constant 0 : index
    %3 = vector.load %arg9[%c0, %c0_1] : memref<16x128xf32, #tpu.memory_space<vmem>>, vector<16x128xf32>
    %c0_2 = arith.constant 0 : index
    %c0_3 = arith.constant 0 : index
    %4 = vector.load %arg2[%c0_2, %c0_3] : memref<16x1024xbf16, #tpu.memory_space<vmem>>, vector<16x1024xbf16>
    %c0_4 = arith.constant 0 : index
    %c0_5 = arith.constant 0 : index
    %5 = vector.load %arg3[%c0_4, %c0_5] : memref<1024x128xbf16, #tpu.memory_space<vmem>>, vector<1024x128xbf16>
    %cst = arith.constant dense<0.000000e+00> : vector<16x128xf32>
    %6 = tpu.matmul %4, %5, %cst {dimension_numbers = #tpu.dot_dimension_numbers<[1], [0], [0], [1], [0, 0, 1, 1], [], []>} : vector<16x1024xbf16>, vector<1024x128xbf16>, vector<16x128xf32> -> vector<16x128xf32>
    %7 = arith.addf %3, %6 : vector<16x128xf32>
    %c0_6 = arith.constant 0 : index
    %c0_7 = arith.constant 0 : index
    %8 = vector.load %arg9[%c0_6, %c0_7] : memref<16x128xf32, #tpu.memory_space<vmem>>, vector<16x128xf32>
    tpu.vector_store %arg9[%c0_6, %c0_7], %7 {strides = array<i32>} : memref<16x128xf32, #tpu.memory_space<vmem>>, vector<16x128xf32>,
    %c0_i32_8 = arith.constant 0 : i32
    %9 = arith.cmpi eq, %arg1, %c0_i32_8 : i32
    %10 = arith.extui %9 : i1 to i32
    %c0_i32_9 = arith.constant 0 : i32
    %11 = arith.cmpi ne, %10, %c0_i32_9 : i32
    scf.if %11 {
      %c0_10 = arith.constant 0 : index
      %c0_11 = arith.constant 0 : index
      %12 = vector.load %arg9[%c0_10, %c0_11] : memref<16x128xf32, #tpu.memory_space<vmem>>, vector<16x128xf32>
      %c0_12 = arith.constant 0 : index
      %c0_13 = arith.constant 0 : index
      %13 = vector.load %arg4[%c0_12, %c0_13] : memref<1x128xf32, #tpu.memory_space<vmem>>, vector<1x128xf32>
      %14 = vector.broadcast %13 : vector<1x128xf32> to vector<16x128xf32>
      %15 = arith.addf %12, %14 : vector<16x128xf32>
      %c0_14 = arith.constant 0 : index
      %c0_15 = arith.constant 0 : index
      %16 = vector.load %arg7[%c0_14, %c0_15] : memref<16x128xf32, #tpu.memory_space<vmem>>, vector<16x128xf32>
      tpu.vector_store %arg7[%c0_14, %c0_15], %15 {strides = array<i32>} : memref<16x128xf32, #tpu.memory_space<vmem>>, vector<16x128xf32>,
      %17 = arith.truncf %15 : vector<16x128xf32> to vector<16x128xbf16>
      %c0_16 = arith.constant 0 : index
      %c0_17 = arith.constant 0 : index
      %18 = vector.load %arg5[%c0_16, %c0_17] : memref<128x128xbf16, #tpu.memory_space<vmem>>, vector<128x128xbf16>
      %cst_18 = arith.constant dense<0.000000e+00> : vector<16x128xf32>
      %19 = tpu.matmul %17, %18, %cst_18 {dimension_numbers = #tpu.dot_dimension_numbers<[1], [0], [0], [1], [0, 0, 1, 1], [], []>} : vector<16x128xbf16>, vector<128x128xbf16>, vector<16x128xf32> -> vector<16x128xf32>
      %c0_19 = arith.constant 0 : index
      %c0_20 = arith.constant 0 : index
      %20 = vector.load %arg6[%c0_19, %c0_20] : memref<1x128xf32, #tpu.memory_space<vmem>>, vector<1x128xf32>
      %21 = vector.broadcast %20 : vector<1x128xf32> to vector<16x128xf32>
      %22 = arith.addf %19, %21 : vector<16x128xf32>
      %c0_21 = arith.constant 0 : index
      %c0_22 = arith.constant 0 : index
      %23 = vector.load %arg8[%c0_21, %c0_22] : memref<16x128xf32, #tpu.memory_space<vmem>>, vector<16x128xf32>
      tpu.vector_store %arg8[%c0_21, %c0_22], %22 {strides = array<i32>} : memref<16x128xf32, #tpu.memory_space<vmem>>, vector<16x128xf32>,
    } else {
    }
    return
  }
  func.func @transform_0(%arg0: i32, %arg1: i32) -> (i32, i32) {
    %c0_i32 = arith.constant 0 : i32
    return %arg0, %arg1 : i32, i32
  }
  func.func @transform_1(%arg0: i32, %arg1: i32) -> (i32, i32) {
    %c0_i32 = arith.constant 0 : i32
    %c0_i32_0 = arith.constant 0 : i32
    %c0_i32_1 = arith.constant 0 : i32
    return %c0_i32, %c0_i32_0 : i32, i32
  }
  func.func @transform_2(%arg0: i32, %arg1: i32) -> (i32, i32) {
    %c0_i32 = arith.constant 0 : i32
    %c0_i32_0 = arith.constant 0 : i32
    %c0_i32_1 = arith.constant 0 : i32
    return %c0_i32, %c0_i32_0 : i32, i32
  }
  func.func @transform_3(%arg0: i32, %arg1: i32) -> (i32, i32) {
    %c0_i32 = arith.constant 0 : i32
    %c0_i32_0 = arith.constant 0 : i32
    %c0_i32_1 = arith.constant 0 : i32
    return %c0_i32, %c0_i32_0 : i32, i32
  }
  func.func @transform_4(%arg0: i32, %arg1: i32) -> (i32, i32) {
    %c0_i32 = arith.constant 0 : i32
    %c0_i32_0 = arith.constant 0 : i32
    %c0_i32_1 = arith.constant 0 : i32
    return %c0_i32, %c0_i32_0 : i32, i32
  }
  func.func @transform_5(%arg0: i32, %arg1: i32) -> (i32, i32) {
    %c0_i32 = arith.constant 0 : i32
    %c0_i32_0 = arith.constant 0 : i32
    return %arg0, %c0_i32 : i32, i32
  }
  func.func @transform_6(%arg0: i32, %arg1: i32) -> (i32, i32) {
    %c0_i32 = arith.constant 0 : i32
    %c0_i32_0 = arith.constant 0 : i32
    return %arg0, %c0_i32 : i32, i32
  }
}

module attributes {stable_mosaic.version = 11 : i64} {
  func.func @plc_fused_kernel(%arg0: i32, %arg1: i32, %arg2: memref<16x1024xbf16, #tpu.memory_space<vmem>>, %arg3: memref<1024x128xbf16, #tpu.memory_space<vmem>>, %arg4: memref<1x128xf32, #tpu.memory_space<vmem>>, %arg5: memref<128x128xbf16, #tpu.memory_space<vmem>>, %arg6: memref<1x128xf32, #tpu.memory_space<vmem>>, %arg7: memref<16x128xf32, #tpu.memory_space<vmem>>, %arg8: memref<16x128xf32, #tpu.memory_space<vmem>>, %arg9: memref<16x128xf32, #tpu.memory_space<vmem>>) attributes {dimension_semantics = [#tpu.dimension_semantics<parallel>, #tpu.dimension_semantics<arbitrary>], iteration_bounds = array<i64: 1, 1>, scalar_prefetch = 0 : i64, scratch_operands = 1 : i64, tpu.core_type = #tpu.core_type<tc>, window_params = [{transform_indices = @transform_0, window_bounds = array<i64: 16, 1024>}, {pipeline_mode = #tpu.pipeline_mode<synchronous>, transform_indices = @transform_1, window_bounds = array<i64: 1024, 128>}, {pipeline_mode = #tpu.pipeline_mode<synchronous>, transform_indices = @transform_2, window_bounds = array<i64: 1, 128>}, {pipeline_mode = #tpu.pipeline_mode<synchronous>, transform_indices = @transform_3, window_bounds = array<i64: 128, 128>}, {pipeline_mode = #tpu.pipeline_mode<synchronous>, transform_indices = @transform_4, window_bounds = array<i64: 1, 128>}, {transform_indices = @transform_5, window_bounds = array<i64: 16, 128>}, {transform_indices = @transform_6, window_bounds = array<i64: 16, 128>}]} {
    %c0_i32 = arith.constant 0 : i32
    %0 = arith.cmpi eq, %arg1, %c0_i32 : i32
    %1 = arith.extui %0 : i1 to i32
    %c0_i32_0 = arith.constant 0 : i32
    %2 = arith.cmpi ne, %1, %c0_i32_0 : i32
    scf.if %2 {
      %cst_10 = arith.constant 0.000000e+00 : f32
      %12 = vector.broadcast %cst_10 : f32 to vector<16x128xf32>
      %c0_11 = arith.constant 0 : index
      %c0_12 = arith.constant 0 : index
      %13 = vector.load %arg9[%c0_11, %c0_12] : memref<16x128xf32, #tpu.memory_space<vmem>>, vector<16x128xf32>
      tpu.vector_store %arg9[%c0_11, %c0_12], %12 {strides = array<i32>} : memref<16x128xf32, #tpu.memory_space<vmem>>, vector<16x128xf32>,
    } else {
    }
    %c0 = arith.constant 0 : index
    %c0_1 = arith.constant 0 : index
    %3 = vector.load %arg9[%c0, %c0_1] : memref<16x128xf32, #tpu.memory_space<vmem>>, vector<16x128xf32>
    %c0_2 = arith.constant 0 : index
    %c0_3 = arith.constant 0 : index
    %4 = vector.load %arg2[%c0_2, %c0_3] : memref<16x1024xbf16, #tpu.memory_space<vmem>>, vector<16x1024xbf16>
    %c0_4 = arith.constant 0 : index
    %c0_5 = arith.constant 0 : index
    %5 = vector.load %arg3[%c0_4, %c0_5] : memref<1024x128xbf16, #tpu.memory_space<vmem>>, vector<1024x128xbf16>
    %cst = arith.constant dense<0.000000e+00> : vector<16x128xf32>
    %6 = tpu.matmul %4, %5, %cst {dimension_numbers = #tpu.dot_dimension_numbers<[1], [0], [0], [1], [0, 0, 1, 1], [], []>} : vector<16x1024xbf16>, vector<1024x128xbf16>, vector<16x128xf32> -> vector<16x128xf32>
    %7 = arith.addf %3, %6 : vector<16x128xf32>
    %c0_6 = arith.constant 0 : index
    %c0_7 = arith.constant 0 : index
    %8 = vector.load %arg9[%c0_6, %c0_7] : memref<16x128xf32, #tpu.memory_space<vmem>>, vector<16x128xf32>
    tpu.vector_store %arg9[%c0_6, %c0_7], %7 {strides = array<i32>} : memref<16x128xf32, #tpu.memory_space<vmem>>, vector<16x128xf32>,
    %c0_i32_8 = arith.constant 0 : i32
    %9 = arith.cmpi eq, %arg1, %c0_i32_8 : i32
    %10 = arith.extui %9 : i1 to i32
    %c0_i32_9 = arith.constant 0 : i32
    %11 = arith.cmpi ne, %10, %c0_i32_9 : i32
    scf.if %11 {
      %c0_10 = arith.constant 0 : index
      %c0_11 = arith.constant 0 : index
      %12 = vector.load %arg9[%c0_10, %c0_11] : memref<16x128xf32, #tpu.memory_space<vmem>>, vector<16x128xf32>
      %c0_12 = arith.constant 0 : index
      %c0_13 = arith.constant 0 : index
      %13 = vector.load %arg4[%c0_12, %c0_13] : memref<1x128xf32, #tpu.memory_space<vmem>>, vector<1x128xf32>
      %14 = vector.broadcast %13 : vector<1x128xf32> to vector<16x128xf32>
      %15 = arith.addf %12, %14 : vector<16x128xf32>
      %c0_14 = arith.constant 0 : index
      %c0_15 = arith.constant 0 : index
      %16 = vector.load %arg7[%c0_14, %c0_15] : memref<16x128xf32, #tpu.memory_space<vmem>>, vector<16x128xf32>
      tpu.vector_store %arg7[%c0_14, %c0_15], %15 {strides = array<i32>} : memref<16x128xf32, #tpu.memory_space<vmem>>, vector<16x128xf32>,
      %17 = arith.truncf %15 : vector<16x128xf32> to vector<16x128xbf16>
      %c0_16 = arith.constant 0 : index
      %c0_17 = arith.constant 0 : index
      %18 = vector.load %arg5[%c0_16, %c0_17] : memref<128x128xbf16, #tpu.memory_space<vmem>>, vector<128x128xbf16>
      %cst_18 = arith.constant dense<0.000000e+00> : vector<16x128xf32>
      %19 = tpu.matmul %17, %18, %cst_18 {dimension_numbers = #tpu.dot_dimension_numbers<[1], [0], [0], [1], [0, 0, 1, 1], [], []>} : vector<16x128xbf16>, vector<128x128xbf16>, vector<16x128xf32> -> vector<16x128xf32>
      %c0_19 = arith.constant 0 : index
      %c0_20 = arith.constant 0 : index
      %20 = vector.load %arg6[%c0_19, %c0_20] : memref<1x128xf32, #tpu.memory_space<vmem>>, vector<1x128xf32>
      %21 = vector.broadcast %20 : vector<1x128xf32> to vector<16x128xf32>
      %22 = arith.addf %19, %21 : vector<16x128xf32>
      %c0_21 = arith.constant 0 : index
      %c0_22 = arith.constant 0 : index
      %23 = vector.load %arg8[%c0_21, %c0_22] : memref<16x128xf32, #tpu.memory_space<vmem>>, vector<16x128xf32>
      tpu.vector_store %arg8[%c0_21, %c0_22], %22 {strides = array<i32>} : memref<16x128xf32, #tpu.memory_space<vmem>>, vector<16x128xf32>,
    } else {
    }
    return
  }
  func.func @transform_0(%arg0: i32, %arg1: i32) -> (i32, i32) {
    %c0_i32 = arith.constant 0 : i32
    return %arg0, %arg1 : i32, i32
  }
  func.func @transform_1(%arg0: i32, %arg1: i32) -> (i32, i32) {
    %c0_i32 = arith.constant 0 : i32
    %c0_i32_0 = arith.constant 0 : i32
    %c0_i32_1 = arith.constant 0 : i32
    return %c0_i32, %c0_i32_0 : i32, i32
  }
  func.func @transform_2(%arg0: i32, %arg1: i32) -> (i32, i32) {
    %c0_i32 = arith.constant 0 : i32
    %c0_i32_0 = arith.constant 0 : i32
    %c0_i32_1 = arith.constant 0 : i32
    return %c0_i32, %c0_i32_0 : i32, i32
  }
  func.func @transform_3(%arg0: i32, %arg1: i32) -> (i32, i32) {
    %c0_i32 = arith.constant 0 : i32
    %c0_i32_0 = arith.constant 0 : i32
    %c0_i32_1 = arith.constant 0 : i32
    return %c0_i32, %c0_i32_0 : i32, i32
  }
  func.func @transform_4(%arg0: i32, %arg1: i32) -> (i32, i32) {
    %c0_i32 = arith.constant 0 : i32
    %c0_i32_0 = arith.constant 0 : i32
    %c0_i32_1 = arith.constant 0 : i32
    return %c0_i32, %c0_i32_0 : i32, i32
  }
  func.func @transform_5(%arg0: i32, %arg1: i32) -> (i32, i32) {
    %c0_i32 = arith.constant 0 : i32
    %c0_i32_0 = arith.constant 0 : i32
    return %arg0, %c0_i32 : i32, i32
  }
  func.func @transform_6(%arg0: i32, %arg1: i32) -> (i32, i32) {
    %c0_i32 = arith.constant 0 : i32
    %c0_i32_0 = arith.constant 0 : i32
    return %arg0, %c0_i32 : i32, i32
  }
}

</mosaic_0001>

<bundles_post_ra>
// kernel: tpu_custom_call.1
= control target key start
LH: loop header
LB: loop body
LE: loop exit
PB: predicated region body
PF: predicated region fallthrough
CT: control target
= control target key end

     0   :  { %12 = vsyncpa [#allocation4], 0  ;;  %s1641_s0 = inlined_call_operand.hbm [shape: bf16[2,1024], index: 0, kind: input, shape index: {}]   ;;  %s1642_s1 = inlined_call_operand.hbm [shape: bf16[1024,128], index: 1, kind: input, shape index: {}]   ;;  %s1643_s2 = inlined_call_operand.vmem [shape: f32[1,128], index: 2, kind: input, shape index: {}]   ;;  %s1644_s3 = inlined_call_operand.hbm [shape: bf16[128,128], index: 3, kind: input, shape index: {}]   ;;  %s1645_s4 = inlined_call_operand.vmem [shape: f32[1,128], index: 4, kind: input, shape index: {}]   ;;  %s1646_s5 = inlined_call_operand.hbm [shape: f32[2,128], index: 5, kind: output, shape index: {0}]   ;;  %s1647_s6 = inlined_call_operand.hbm [shape: f32[2,128], index: 6, kind: output, shape index: {1}]  }
   0x1   :  { %13 = vsyncpa [#allocation7], 0 }
   0x2   :  { %14 = vsyncpa [#allocation5], 0 }
   0x3   :  { %15 = vsyncpa [#allocation11], 0 }
   0x4   :  { %20 = vsyncadd [#allocation4], 896  ;;  %s1486_s21 = smov [#allocation6]   ;;  %s1368_s25 = scalar_lea.hbm %s1642_s1, 8192 }
   0x5   :  { %s33_s22 = sshll.u32 %s1486_s21, 4  ;;  %p1369_p0 = scmp.ne.s32.totalorder %s1642_s1, %s1368_s25  ;;  %s34_s22 = int_to_ptr.vmem [resolvable:$true] %s33_s22 }
   0x6   :  { %p1372_p1 = scmp.lt.u32.totalorder %s1368_s25, %s1642_s1 }
   0x8   :  { %p1374_p2 = pnand %p1372_p1, %p1369_p0 }
   0xa   :  { %1377 = shalt.err (!%p1374_p2)
}
   0xb   :  { %s1378_s30 = scalar_lea.vmem %s34_s22, 8192  ;;  %p1383_p4 = scmp.lt.s32.totalorder %s34_s22, %s34_s22 }
   0xc   :  { %p1379_p3 = scmp.ne.s32.totalorder %s34_s22, %s1378_s30  ;;  %p1384_p5 = scmp.lt.s32.totalorder %s1378_s30, %s1378_s30 }
   0xe   :  { %p1385_p6 = por %p1384_p5, %p1383_p4 }
  0x10   :  { %p1386_p7 = pnand %p1385_p6, %p1379_p3 }
  0x12   :  { %1389 = shalt.err (!%p1386_p7)
}
  0x13   :  { %s1487_s7 = smov 64   ;;  %s1488_s8 = smov 4  }
  0x14   :  { %39 = dma.hbm_to_vmem [thread:$0]  %s1642_s1, 8192, %s34_s22, [#allocation7], %s1487_s7, %s1487_s7, %s1488_s8  }
  0x15   :  { %s1489_s11 = smov [#allocation3]   ;;  %s1390_s15 = scalar_lea.hbm %s1641_s0, 128 }
  0x16   :  { %s21_s12 = sshll.u32 %s1489_s11, 4  ;;  %p1391_p8 = scmp.ne.s32.totalorder %s1641_s0, %s1390_s15  ;;  %s22_s12 = int_to_ptr.vmem [resolvable:$true] %s21_s12 }
  0x17   :  { %p1394_p9 = scmp.lt.u32.totalorder %s1390_s15, %s1641_s0 }
  0x19   :  { %p1396_p10 = pnand %p1394_p9, %p1391_p8 }
  0x1b   :  { %1399 = shalt.err (!%p1396_p10)
}
  0x1c   :  { %s1400_s20 = scalar_lea.vmem %s22_s12, 128  ;;  %s1404_s1 = scalar_lea.vmem %s22_s12, 1024 }
  0x1d   :  { %p1401_p11 = scmp.ne.s32.totalorder %s22_s12, %s1400_s20  ;;  %p1405_p12 = scmp.lt.s32.totalorder %s22_s12, %s22_s12 }
  0x1e   :  { %p1406_p13 = scmp.lt.s32.totalorder %s1404_s1, %s1400_s20 }
  0x20   :  { %p1407_p0 = por %p1406_p13, %p1405_p12 }
  0x22   :  { %p1408_p1 = pnand %p1407_p0, %p1401_p11 }
  0x24   :  { %1411 = shalt.err (!%p1408_p1)
}
  0x25   :  { %s1490_s21 = smov 128   ;;  %s1491_s22 = smov 8  }
  0x26   :  { %27 = dma.hbm_to_vmem [thread:$0]  %s1641_s0, 128, %s22_s12, [#allocation4], %s1490_s21, %s1490_s21, %s1491_s22  }
  0x27   :  { %s1492_s25 = smov [#allocation8]   ;;  %s1412_s29 = scalar_lea.hbm %s1644_s3, 1024 }
  0x28   :  { %s47_s26 = sshll.u32 %s1492_s25, 4  ;;  %p1413_p2 = scmp.ne.s32.totalorder %s1644_s3, %s1412_s29  ;;  %s48_s26 = int_to_ptr.vmem [resolvable:$true] %s47_s26 }
  0x29   :  { %p1416_p3 = scmp.lt.u32.totalorder %s1412_s29, %s1644_s3 }
  0x2b   :  { %p1418_p4 = pnand %p1416_p3, %p1413_p2 }
  0x2d   :  { %1421 = shalt.err (!%p1418_p4)
}
  0x2e   :  { %s1422_s13 = scalar_lea.vmem %s48_s26, 1024  ;;  %p1427_p6 = scmp.lt.s32.totalorder %s48_s26, %s48_s26 }
  0x2f   :  { %p1423_p5 = scmp.ne.s32.totalorder %s48_s26, %s1422_s13  ;;  %p1428_p7 = scmp.lt.s32.totalorder %s1422_s13, %s1422_s13 }
  0x31   :  { %p1429_p8 = por %p1428_p7, %p1427_p6 }
  0x33   :  { %p1430_p9 = pnand %p1429_p8, %p1423_p5 }
  0x35   :  { %1433 = shalt.err (!%p1430_p9)
}
  0x36   :  { %53 = dma.hbm_to_vmem [thread:$0]  %s1644_s3, 1024, %s48_s26, [#allocation7], %s1487_s7, %s1487_s7, %s1488_s8  }
  0x37   :  { %1478 = dma.done.wait [#allocation4], 1024  }
  0x38   :  { %1479 = vsyncadd [#allocation4], 4294966272 }
  0x39   :  { %1480 = dma.done.wait [#allocation7], 9216  }
  0x3a   :  { %1481 = vsyncadd [#allocation7], 4294958080  ;;  %v1284_v0 = vld [vmem:[#allocation6 + $0x40] sm:$0xff]   ;;  %v1288_v4 = vld [vmem:[#allocation6 + $0x48] sm:$0xff]   ;;  %v1493_v25 = vmov 1966171168   ;;  %v229_v27 = vlaneseq }
  0x3b   :  { %v1285_v1 = vld [vmem:[#allocation6 + $0xc0] sm:$0xff]   ;;  %1153 = vmatprep.subr.bf16.mxu0 %v1284_v0  ;;  %v1289_v5 = vld [vmem:[#allocation6 + $0xc8] sm:$0xff]   ;;  %v1292_v8 = vld [vmem:[#allocation6 + $0x50] sm:$0xff]   ;;  %v227_v26 = vunpack.c.l.s4 %v1493_v25  ;;  %vm1495_vm0 = vmmov 0  }
  0x3c   :  { %v1286_v2 = vld [vmem:[#allocation6] sm:$0xff]   ;;  %1175 = vmatprep.subr.bf16.mxu1 %v1285_v1  ;;  %v1290_v6 = vld [vmem:[#allocation6 + $0x8] sm:$0xff]   ;;  %v1293_v9 = vld [vmem:[#allocation6 + $0xd0] sm:$0xff]   ;;  %v230_v33 = vshrl.u32 %v229_v27, 7 }
  0x3d   :  { %v1287_v3 = vld [vmem:[#allocation6 + $0x80] sm:$0xff]   ;;  %1154 = vmatpush3.bf16.msra.mxu0 %v1286_v2  ;;  %v1291_v7 = vld [vmem:[#allocation6 + $0x88] sm:$0xff]   ;;  %v1294_v10 = vld [vmem:[#allocation6 + $0x10] sm:$0xff]   ;;  %v228_v32 = vunpack.c.0.s8 %v227_v26 }
  0x3e   :  { %1176 = vmatpush3.bf16.msra.mxu1 %v1287_v3  ;;  %1155 = vmatprep.subr.bf16.mxu0 %v1288_v4  ;;  %v1295_v11 = vld [vmem:[#allocation6 + $0x90] sm:$0xff]   ;;  %v1296_v12 = vld [vmem:[#allocation6 + $0x58] sm:$0xff]   ;;  %v1300_v16 = vld [vmem:[#allocation6 + $0x60] sm:$0xff]  }
  0x3f   :  { %1177 = vmatprep.subr.bf16.mxu1 %v1289_v5  ;;  %v1297_v13 = vld [vmem:[#allocation6 + $0xd8] sm:$0xff]   ;;  %v1301_v17 = vld [vmem:[#allocation6 + $0xe0] sm:$0xff]   ;;  %v1304_v20 = vld [vmem:[#allocation6 + $0x68] sm:$0xff]   ;;  %v1577_v37 = vsub.s32 %v228_v32, %v230_v33 }
  0x40   :  { %v1298_v14 = vld [vmem:[#allocation6 + $0x18] sm:$0xff]   ;;  %v1302_v18 = vld [vmem:[#allocation6 + $0x20] sm:$0xff]   ;;  %v1305_v21 = vld [vmem:[#allocation6 + $0xe8] sm:$0xff]  }
  0x41   :  { %1156 = vmatpush3.bf16.msra.mxu0 %v1290_v6  ;;  %v1299_v15 = vld [vmem:[#allocation6 + $0x98] sm:$0xff]   ;;  %v1303_v19 = vld [vmem:[#allocation6 + $0xa0] sm:$0xff]   ;;  %v1306_v22 = vld [vmem:[#allocation6 + $0x28] sm:$0xff]  }
  0x42   :  { %1178 = vmatpush3.bf16.msra.mxu1 %v1291_v7  ;;  %1157 = vmatprep.subr.bf16.mxu0 %v1292_v8  ;;  %v1307_v23 = vld [vmem:[#allocation6 + $0xa8] sm:$0xff]   ;;  %v1308_v24 = vld [vmem:[#allocation6 + $0x70] sm:$0xff]   ;;  %v1312_v31 = vld [vmem:[#allocation6 + $0x78] sm:$0xff]  }
  0x43   :  { %1179 = vmatprep.subr.bf16.mxu1 %v1293_v9  ;;  %v1309_v28 = vld [vmem:[#allocation6 + $0xf0] sm:$0xff]   ;;  %v1313_v34 = vld [vmem:[#allocation6 + $0xf8] sm:$0xff]   ;;  %v1316_v38 = vld [vmem:[#allocation3] ss:$8 sps:$4 sm:$0xff]  }
  0x44   :  { %v1310_v29 = vld [vmem:[#allocation6 + $0x30] sm:$0xff]   ;;  %v1314_v35 = vld [vmem:[#allocation6 + $0x38] sm:$0xff]   ;;  %v1318_v39 = vld [vmem:[#allocation3 + $0x4] ss:$8 sps:$4 sm:$0xff]   ;;  %v232_v45 = vrot.slane %v1316_v38, %v1577_v37 }
  0x45   :  { %1158 = vmatpush3.bf16.msra.mxu0 %v1294_v10  ;;  %v1311_v30 = vld [vmem:[#allocation6 + $0xb0] sm:$0xff]   ;;  %v1315_v36 = vld [vmem:[#allocation6 + $0xb8] sm:$0xff]   ;;  %v1322_v42 = vld [vmem:[#allocation3 + $0x20] ss:$8 sps:$4 sm:$0xff]   ;;  %v1582_v48 = vrot.slane %v1318_v39, %v1577_v37 }
  0x46   :  { %1180 = vmatpush3.bf16.msra.mxu1 %v1295_v11  ;;  %1159 = vmatprep.subr.bf16.mxu0 %v1296_v12  ;;  %v1319_v40 = vld [vmem:[#allocation3 + $0x10] ss:$8 sps:$4 sm:$0xff]   ;;  %v1321_v41 = vld [vmem:[#allocation3 + $0x14] ss:$8 sps:$4 sm:$0xff]   ;;  %v1324_v43 = vld [vmem:[#allocation3 + $0x24] ss:$8 sps:$4 sm:$0xff]   ;;  %v260_v50 = vrot.slane %v1322_v42, %v1577_v37 }
  0x47   :  { %1181 = vmatprep.subr.bf16.mxu1 %v1297_v13  ;;  %v1325_v44 = vld [vmem:[#allocation3 + $0x30] ss:$8 sps:$4 sm:$0xff]   ;;  %v1327_v46 = vld [vmem:[#allocation3 + $0x34] ss:$8 sps:$4 sm:$0xff]   ;;  %v246_v47 = vrot.slane %v1319_v40, %v1577_v37  ;;  %v1585_v49 = vrot.slane %v1321_v41, %v1577_v37  ;;  %v1328_v52 = vld [vmem:[#allocation6 + $0x140] sm:$0xff]   ;;  %v1590_v53 = vrot.slane %v1324_v43, %v1577_v37 }
  0x48   :  { %v274_v51 = vrot.slane %v1325_v44, %v1577_v37  ;;  %v1329_v56 = vld [vmem:[#allocation6 + $0x1c0] sm:$0xff]   ;;  %v1593_v57 = vrot.slane %v1327_v46, %v1577_v37  ;;  %v1332_v10 = vld [vmem:[#allocation6 + $0x148] sm:$0xff]   ;;  %v1352_v32 = vld [vmem:[#allocation6 + $0x170] sm:$0xff]  }
  0x49   :  { %1160 = vmatpush3.bf16.msra.mxu0 %v1298_v14  ;;  %v283_v54 = vcombine.high %v232_v45, %v246_v47  ;;  %v282_v55 = vcombine.low %v232_v45, %v246_v47  ;;  %v285_v58 = vcombine.high %v1582_v48, %v1585_v49  ;;  %v1330_v2 = vld [vmem:[#allocation6 + $0x100] sm:$0xff]   ;;  %v1333_v11 = vld [vmem:[#allocation6 + $0x1c8] sm:$0xff]   ;;  %v1353_v33 = vld [vmem:[#allocation6 + $0x1f0] sm:$0xff]  }
  0x4a   :  { %1182 = vmatpush3.bf16.msra.mxu1 %v1299_v15  ;;  %1161 = vmatprep.subr.bf16.mxu0 %v1300_v16  ;;  %v287_v59 = vcombine.high %v260_v50, %v274_v51  ;;  %v286_v60 = vcombine.low %v260_v50, %v274_v51  ;;  %v289_v63 = vcombine.high %v1590_v53, %v1593_v57  ;;  %v1331_v4 = vld [vmem:[#allocation6 + $0x180] sm:$0xff]   ;;  %v1334_v12 = vld [vmem:[#allocation6 + $0x108] sm:$0xff]   ;;  %v1336_v16 = vld [vmem:[#allocation6 + $0x150] sm:$0xff]  }
  0x4b   :  { %1183 = vmatprep.subr.bf16.mxu1 %v1301_v17  ;;  %v310_v61 = vrot.slane %v283_v54, %v1577_v37  ;;  %v296_v62 = vrot.slane %v282_v55, %v1577_v37  ;;  %v317_v3 = vrot.slane %v285_v58, %v1577_v37  ;;  %v1335_v15 = vld [vmem:[#allocation6 + $0x188] sm:$0xff]   ;;  %v1337_v17 = vld [vmem:[#allocation6 + $0x1d0] sm:$0xff]   ;;  %v1345_v25 = vld [vmem:[#allocation6 + $0x1e0] sm:$0xff]   ;;  %v288_v38 = vcombine.low %v1590_v53, %v1593_v57 }
  0x4c   :  { %v338_v0 = vrot.slane %v287_v59, %v1577_v37  ;;  %v324_v1 = vrot.slane %v286_v60, %v1577_v37  ;;  %v345_v5 = vrot.slane %v289_v63, %v1577_v37  ;;  %v1346_v26 = vld [vmem:[#allocation6 + $0x120] sm:$0xff]   ;;  %v1356_v39 = vld [vmem:[#allocation6 + $0x178] sm:$0xff]   ;;  %v1362_v50 = vld [vmem:[#allocation8 + $0x10] sm:$0xff]  }
  0x4d   :  { %1162 = vmatpush3.bf16.msra.mxu0 %v1302_v18  ;;  %v1338_v18 = vld [vmem:[#allocation6 + $0x110] sm:$0xff]   ;;  %v1347_v27 = vld [vmem:[#allocation6 + $0x1a0] sm:$0xff]   ;;  %v1357_v40 = vld [vmem:[#allocation6 + $0x1f8] sm:$0xff]   ;;  %v331_v44 = vrot.slane %v288_v38, %v1577_v37 }
  0x4e   :  { %1184 = vmatpush3.bf16.msra.mxu1 %v1303_v19  ;;  %1163 = vmatprep.subr.bf16.mxu0 %v1304_v20  ;;  %v350_v6 = vcombine.low %v310_v61, %v338_v0  ;;  %v351_v7 = vcombine.high %v310_v61, %v338_v0  ;;  %v346_v8 = vcombine.low %v296_v62, %v324_v1  ;;  %v1339_v19 = vld [vmem:[#allocation6 + $0x190] sm:$0xff]   ;;  %v1340_v20 = vld [vmem:[#allocation6 + $0x158] sm:$0xff]   ;;  %v1360_v47 = vld [vmem:[#allocation8] sm:$0xff]  }
  0x4f   :  { %1185 = vmatprep.subr.bf16.mxu1 %v1305_v21  ;;  %v347_v9 = vcombine.high %v296_v62, %v324_v1  ;;  %v352_v13 = vcombine.low %v317_v3, %v345_v5  ;;  %v353_v14 = vcombine.high %v317_v3, %v345_v5  ;;  %v1341_v21 = vld [vmem:[#allocation6 + $0x1d8] sm:$0xff]   ;;  %v1364_v51 = vld [vmem:[#allocation8 + $0x20] sm:$0xff]   ;;  %v1366_v53 = vld [vmem:[#allocation8 + $0x30] sm:$0xff]  }
  0x50   :  { %778 = vmatprep.mubr.bf16.mxu0 %v350_v6  ;;  %819 = vmatprep.mubr.bf16.mxu1 %v351_v7  ;;  %v1358_v41 = vld [vmem:[#allocation6 + $0x138] sm:$0xff]  }
  0x51   :  { %1164 = vmatpush3.bf16.msra.mxu0 %v1306_v22  ;;  %v1342_v22 = vld [vmem:[#allocation6 + $0x118] sm:$0xff]  }
  0x52   :  { %1186 = vmatpush3.bf16.msra.mxu1 %v1307_v23  ;;  %1165 = vmatprep.subr.bf16.mxu0 %v1308_v24  ;;  %v1343_v23 = vld [vmem:[#allocation6 + $0x198] sm:$0xff]   ;;  %v1344_v24 = vld [vmem:[#allocation6 + $0x160] sm:$0xff]  }
  0x53   :  { %1187 = vmatprep.subr.bf16.mxu1 %v1309_v28  ;;  %v1348_v28 = vld [vmem:[#allocation6 + $0x168] sm:$0xff]   ;;  %v1359_v42 = vld [vmem:[#allocation6 + $0x1b8] sm:$0xff]  }
  0x54   :  { %v1367_v54 = vld [vmem:[#allocation8 + $0x38] sm:$0xff]  }
  0x55   :  { %1166 = vmatpush3.bf16.msra.mxu0 %v1310_v29  ;;  %v1349_v29 = vld [vmem:[#allocation6 + $0x1e8] sm:$0xff]  }
  0x56   :  { %1188 = vmatpush3.bf16.msra.mxu1 %v1311_v30  ;;  %1167 = vmatprep.subr.bf16.mxu0 %v1312_v31  ;;  %v1350_v30 = vld [vmem:[#allocation6 + $0x128] sm:$0xff]  }
  0x57   :  { %1189 = vmatprep.subr.bf16.mxu1 %v1313_v34  ;;  %v1351_v31 = vld [vmem:[#allocation6 + $0x1a8] sm:$0xff]   ;;  %v1354_v34 = vld [vmem:[#allocation6 + $0x130] sm:$0xff]  }
  0x59   :  { %1168 = vmatpush3.bf16.msra.mxu0 %v1314_v35  ;;  %v1355_v35 = vld [vmem:[#allocation6 + $0x1b0] sm:$0xff]  }
  0x5a   :  { %1190 = vmatpush3.bf16.msra.mxu1 %v1315_v36  ;;  %1197 = vmatprep.subr.bf16.mxu0 %v1328_v52  ;;  %v284_v36 = vcombine.low %v1582_v48, %v1585_v49  ;;  %v1494_v48 = vmov 0.0   ;;  %v1361_v49 = vld [vmem:[#allocation8 + $0x8] sm:$0xff]  }
  0x5b   :  { %1219 = vmatprep.subr.bf16.mxu1 %v1329_v56  ;;  %v1365_v52 = vld [vmem:[#allocation8 + $0x28] sm:$0xff]  }
  0x5c   :  { %779 = vmatmul.mubr.bf16.vlgmr.msra.gmra.mrb[0].mxu0 %v346_v8  ;;  %v303_v43 = vrot.slane %v284_v36, %v1577_v37  ;;  %v1363_v37 = vld [vmem:[#allocation8 + $0x18] sm:$0xff]  }
  0x5d   :  { %820 = vmatmul.mubr.bf16.vlgmr.msra.gmra.mrb[0].mxu1 %v347_v9  ;;  %1198 = vmatpush3.bf16.msra.mxu0 %v1330_v2 }
  0x5e   :  { %1220 = vmatpush3.bf16.msra.mxu1 %v1331_v4  ;;  %1199 = vmatprep.subr.bf16.mxu0 %v1332_v10  ;;  %v348_v45 = vcombine.low %v303_v43, %v331_v44  ;;  %v349_v46 = vcombine.high %v303_v43, %v331_v44 }
  0x5f   :  { %1221 = vmatprep.subr.bf16.mxu1 %v1333_v11  ;;  %860 = vmatprep.mubr.bf16.mxu0 %v352_v13 }
  0x60   :  { %901 = vmatprep.mubr.bf16.mxu1 %v353_v14 }
  0x61   :  { %1200 = vmatpush3.bf16.msra.mxu0 %v1334_v12 }
  0x62   :  { %1222 = vmatpush3.bf16.msra.mxu1 %v1335_v15  ;;  %1201 = vmatprep.subr.bf16.mxu0 %v1336_v16 }
  0x63   :  { %1223 = vmatprep.subr.bf16.mxu1 %v1337_v17 }
  0x65   :  { %1202 = vmatpush3.bf16.msra.mxu0 %v1338_v18  ;;  %v1143_v18 = vld [vmem:[%s1643_s2] ss:$0 sm:$0xff] }
  0x66   :  { %1224 = vmatpush3.bf16.msra.mxu1 %v1339_v19  ;;  %1203 = vmatprep.subr.bf16.mxu0 %v1340_v20 }
  0x67   :  { %1225 = vmatprep.subr.bf16.mxu1 %v1341_v21 }
  0x69   :  { %1204 = vmatpush3.bf16.msra.mxu0 %v1342_v22 }
  0x6a   :  { %1226 = vmatpush3.bf16.msra.mxu1 %v1343_v23  ;;  %1205 = vmatprep.subr.bf16.mxu0 %v1344_v24 }
  0x6b   :  { %1227 = vmatprep.subr.bf16.mxu1 %v1345_v25  ;;  %v1144_v25 = vld [vmem:[%s1645_s4] ss:$0 sm:$0xff] }
  0x6d   :  { %1206 = vmatpush3.bf16.msra.mxu0 %v1346_v26 }
  0x6e   :  { %1228 = vmatpush3.bf16.msra.mxu1 %v1347_v27  ;;  %1207 = vmatprep.subr.bf16.mxu0 %v1348_v28 }
  0x6f   :  { %1229 = vmatprep.subr.bf16.mxu1 %v1349_v29 }
  0x71   :  { %1208 = vmatpush3.bf16.msra.mxu0 %v1350_v30 }
  0x72   :  { %1230 = vmatpush3.bf16.msra.mxu1 %v1351_v31  ;;  %1209 = vmatprep.subr.bf16.mxu0 %v1352_v32 }
  0x73   :  { %1231 = vmatprep.subr.bf16.mxu1 %v1353_v33 }
  0x75   :  { %1210 = vmatpush3.bf16.msra.mxu0 %v1354_v34 }
  0x76   :  { %1232 = vmatpush3.bf16.msra.mxu1 %v1355_v35  ;;  %1211 = vmatprep.subr.bf16.mxu0 %v1356_v39 }
  0x77   :  { %1233 = vmatprep.subr.bf16.mxu1 %v1357_v40 }
  0x79   :  { %1212 = vmatpush3.bf16.msra.mxu0 %v1358_v41 }
  0x7a   :  { %1234 = vmatpush3.bf16.msra.mxu1 %v1359_v42  ;;  %1250 = vmatprep.subr.bf16.mxu0 %v1494_v48 }
  0x7c   :  { %861 = vmatmul.mubr.bf16.vlgmr.msra.gmra.mrb[4].mxu0 %v348_v45 }
  0x7d   :  { %902 = vmatmul.mubr.bf16.vlgmr.msra.gmra.mrb[4].mxu1 %v349_v46  ;;  %1251 = vmatpush3.bf16.msra.mxu0 %v1360_v47 }
  0x7e   :  { %1252 = vmatprep.subr.bf16.mxu0 %v1494_v48  ;;  %1266 = vmatprep.mubr.msk.bf16.mxu0 %vm1495_vm0, %v1494_v48 }
  0x81   :  { %1253 = vmatpush3.bf16.msra.mxu0 %v1361_v49 }
  0x82   :  { %1254 = vmatprep.subr.bf16.mxu0 %v1494_v48 }
  0x85   :  { %1255 = vmatpush3.bf16.msra.mxu0 %v1362_v50 }
  0x86   :  { %1256 = vmatprep.subr.bf16.mxu0 %v1494_v48 }
  0x89   :  { %1257 = vmatpush3.bf16.msra.mxu0 %v1363_v37 }
  0x8a   :  { %1258 = vmatprep.subr.bf16.mxu0 %v1494_v48 }
  0x8d   :  { %1259 = vmatpush3.bf16.msra.mxu0 %v1364_v51 }
  0x8e   :  { %1260 = vmatprep.subr.bf16.mxu0 %v1494_v48 }
  0x91   :  { %1261 = vmatpush3.bf16.msra.mxu0 %v1365_v52 }
  0x92   :  { %1262 = vmatprep.subr.bf16.mxu0 %v1494_v48 }
  0x95   :  { %1263 = vmatpush3.bf16.msra.mxu0 %v1366_v53 }
  0x96   :  { %1264 = vmatprep.subr.bf16.mxu0 %v1494_v48 }
  0x99   :  { %1265 = vmatpush3.bf16.msra.mxu0 %v1367_v54 }
 0x12f   :  { %v1169_v55 = vpop.f32.mrb[0].mxu0 }
 0x130   :  { %v1191_v56 = vpop.f32.mrb[0].mxu1  ;;  %v1170_v57 = vpop.f32.mrb[1].mxu0 }
 0x131   :  { %v1192_v58 = vpop.f32.mrb[1].mxu1  ;;  %v1171_v59 = vadd.f32 %v1170_v57, %v1169_v55  ;;  %v1172_v61 = vpop.f32.mrb[2].mxu0 }
 0x132   :  { %v1193_v60 = vadd.f32 %v1192_v58, %v1191_v56  ;;  %v1194_v62 = vpop.f32.mrb[2].mxu1  ;;  %v1173_v63 = vpop.f32.mrb[3].mxu0 }
 0x133   :  { %v1195_v0 = vpop.f32.mrb[3].mxu1  ;;  %v1174_v2 = vadd.f32 %v1173_v63, %v1172_v61 }
 0x134   :  { %v822_v1 = vadd.f32 %v1193_v60, %v1171_v59  ;;  %v1196_v3 = vadd.f32 %v1195_v0, %v1194_v62 }
 0x136   :  { %v825_v4 = vadd.f32 %v1196_v3, %v1174_v2 }
 0x14f   :  { %v1213_v5 = vpop.f32.mrb[4].mxu0 }
 0x150   :  { %v1235_v6 = vpop.f32.mrb[4].mxu1  ;;  %v1214_v7 = vpop.f32.mrb[5].mxu0 }
 0x151   :  { %v1236_v8 = vpop.f32.mrb[5].mxu1  ;;  %v1215_v9 = vadd.f32 %v1214_v7, %v1213_v5  ;;  %v1216_v11 = vpop.f32.mrb[6].mxu0 }
 0x152   :  { %v1237_v10 = vadd.f32 %v1236_v8, %v1235_v6  ;;  %v1238_v12 = vpop.f32.mrb[6].mxu1  ;;  %v1217_v13 = vpop.f32.mrb[7].mxu0 }
 0x153   :  { %v1239_v14 = vpop.f32.mrb[7].mxu1  ;;  %v863_v15 = vadd.f32 %v1215_v9, %v822_v1  ;;  %v1218_v16 = vadd.f32 %v1217_v13, %v1216_v11 }
 0x154   :  { %v1240_v17 = vadd.f32 %v1239_v14, %v1238_v12 }
 0x155   :  { %v904_v19 = vadd.f32 %v1237_v10, %v863_v15  ;;  %v866_v20 = vadd.f32 %v1218_v16, %v825_v4 }
 0x157   :  { %v926_v21 = vadd.f32 %v1143_v18, %v904_v19  ;;  %v907_v22 = vadd.f32 %v1240_v17, %v866_v20 }
 0x159   :  { %928 = vst [vmem:[#allocation9] sm:$0xff] %v926_v21  ;;  %v927_v23 = vadd.f32 %v1143_v18, %v907_v22 }
 0x15b   :  { %929 = vst [vmem:[#allocation9 + $0x8] sm:$0xff] %v927_v23  ;;  %v930_v24 = vpack.c.bf16 %v927_v23, %v926_v21 }
 0x15d   :  { %1267 = vmatmul.mubr.bf16.vlgmr.msra.gmra.mrb[8].mxu0 %v930_v24 }
 0x230   :  { %v1036_v26 = vpop.f32.mrb[8].mxu0 }
 0x231   :  { %v1037_v27 = vadd.f32 %v1144_v25, %v1036_v26  ;;  %v1268_v28 = vpop.f32.mrb[9].mxu0 }
 0x232   :  { %v1039_v29 = vpop.f32.mrb[10].mxu0 }
 0x233   :  { %1043 = vst [vmem:[#allocation10] sm:$0xff] %v1037_v27  ;;  %v1040_v30 = vadd.f32 %v1144_v25, %v1039_v29  ;;  %v1269_v31 = vpop.f32.mrb[11].mxu0 }
 0x235   :  { %1044 = vst [vmem:[#allocation10 + $0x8] sm:$0xff] %v1040_v30 }
 0x236   :  { %1049 = vsyncadd [#allocation5], 224  ;;  %s1496_s2 = smov [#allocation9]  }
 0x237   :  { %s1050_s15 = sshll.u32 %s1496_s2, 4  ;;  %s1051_s15 = int_to_ptr.vmem [resolvable:$true] %s1050_s15 }
 0x238   :  { %s1434_s16 = scalar_lea.vmem %s1051_s15, 32  ;;  %s1438_s17 = scalar_lea.vmem %s1051_s15, 256 }
 0x239   :  { %p1435_p10 = scmp.ne.s32.totalorder %s1051_s15, %s1434_s16  ;;  %p1439_p11 = scmp.lt.s32.totalorder %s1051_s15, %s1051_s15 }
 0x23a   :  { %p1440_p12 = scmp.lt.s32.totalorder %s1438_s17, %s1434_s16 }
 0x23c   :  { %p1441_p13 = por %p1440_p12, %p1439_p11 }
 0x23e   :  { %p1442_p0 = pnand %p1441_p13, %p1435_p10 }
 0x240   :  { %1445 = shalt.err (!%p1442_p0)
}
 0x241   :  { %s1446_s19 = scalar_lea.hbm %s1646_s5, 32 }
 0x242   :  { %p1447_p1 = scmp.ne.s32.totalorder %s1646_s5, %s1446_s19  ;;  %p1450_p2 = scmp.lt.u32.totalorder %s1446_s19, %s1646_s5 }
 0x244   :  { %p1452_p3 = pnand %p1450_p2, %p1447_p1 }
 0x246   :  { %1455 = shalt.err (!%p1452_p3)
}
 0x247   :  { %s1497_s23 = smov 32   ;;  %s1498_s24 = smov 2  }
 0x248   :  { %1056 = dma.vmem_to_hbm [thread:$0]  %s1051_s15, 32, %s1646_s5, [#allocation5], %s1497_s23, %s1497_s23, %s1498_s24  }
 0x249   :  { %1061 = vsyncadd [#allocation11], 224  ;;  %s1499_s27 = smov [#allocation10]  }
 0x24a   :  { %s1062_s28 = sshll.u32 %s1499_s27, 4  ;;  %s1063_s28 = int_to_ptr.vmem [resolvable:$true] %s1062_s28 }
 0x24b   :  { %s1456_s29 = scalar_lea.vmem %s1063_s28, 32  ;;  %s1460_s30 = scalar_lea.vmem %s1063_s28, 256 }
 0x24c   :  { %p1457_p4 = scmp.ne.s32.totalorder %s1063_s28, %s1456_s29  ;;  %p1461_p5 = scmp.lt.s32.totalorder %s1063_s28, %s1063_s28 }
 0x24d   :  { %p1462_p6 = scmp.lt.s32.totalorder %s1460_s30, %s1456_s29 }
 0x24f   :  { %p1463_p7 = por %p1462_p6, %p1461_p5 }
 0x251   :  { %p1464_p8 = pnand %p1463_p7, %p1457_p4 }
 0x253   :  { %1467 = shalt.err (!%p1464_p8)
}
 0x254   :  { %s1468_s11 = scalar_lea.hbm %s1647_s6, 32 }
 0x255   :  { %p1469_p9 = scmp.ne.s32.totalorder %s1647_s6, %s1468_s11  ;;  %p1472_p10 = scmp.lt.u32.totalorder %s1468_s11, %s1647_s6 }
 0x257   :  { %p1474_p11 = pnand %p1472_p10, %p1469_p9 }
 0x259   :  { %1477 = shalt.err (!%p1474_p11)
}
 0x25a   :  { %1068 = dma.vmem_to_hbm [thread:$0]  %s1063_s28, 32, %s1647_s6, [#allocation11], %s1497_s23, %s1497_s23, %s1498_s24  }
 0x25b   :  { %1482 = dma.done.wait [#allocation5], 256  }
 0x25c   :  { %1483 = vsyncadd [#allocation5], 4294967040 }
 0x25d   :  { %1484 = dma.done.wait [#allocation11], 256  }
 0x25e   :  { %1485 = vsyncadd [#allocation11], 4294967040 }
 0x25f   :  { %1075 = vsyncpa [#allocation4], 1 }
 0x260   :  { %1076 = vsyncpa [#allocation7], 1 }
 0x261   :  { %1077 = vsyncpa [#allocation5], 1 }
 0x262   :  { %1078 = vsyncpa [#allocation11], 1 }

// kernel: tpu_custom_call.1
= control target key start
LH: loop header
LB: loop body
LE: loop exit
PB: predicated region body
PF: predicated region fallthrough
CT: control target
= control target key end

     0   :  { %12 = vsyncpa [#allocation4], 0  ;;  %s1641_s0 = inlined_call_operand.hbm [shape: bf16[2,1024], index: 0, kind: input, shape index: {}]   ;;  %s1642_s1 = inlined_call_operand.hbm [shape: bf16[1024,128], index: 1, kind: input, shape index: {}]   ;;  %s1643_s2 = inlined_call_operand.vmem [shape: f32[1,128], index: 2, kind: input, shape index: {}]   ;;  %s1644_s3 = inlined_call_operand.hbm [shape: bf16[128,128], index: 3, kind: input, shape index: {}]   ;;  %s1645_s4 = inlined_call_operand.vmem [shape: f32[1,128], index: 4, kind: input, shape index: {}]   ;;  %s1646_s5 = inlined_call_operand.hbm [shape: f32[2,128], index: 5, kind: output, shape index: {0}]   ;;  %s1647_s6 = inlined_call_operand.hbm [shape: f32[2,128], index: 6, kind: output, shape index: {1}]  }
   0x1   :  { %13 = vsyncpa [#allocation7], 0 }
   0x2   :  { %14 = vsyncpa [#allocation5], 0 }
   0x3   :  { %15 = vsyncpa [#allocation11], 0 }
   0x4   :  { %20 = vsyncadd [#allocation4], 896  ;;  %s1486_s21 = smov [#allocation6]   ;;  %s1368_s25 = scalar_lea.hbm %s1642_s1, 8192 }
   0x5   :  { %s33_s22 = sshll.u32 %s1486_s21, 4  ;;  %p1369_p0 = scmp.ne.s32.totalorder %s1642_s1, %s1368_s25  ;;  %s34_s22 = int_to_ptr.vmem [resolvable:$true] %s33_s22 }
   0x6   :  { %p1372_p1 = scmp.lt.u32.totalorder %s1368_s25, %s1642_s1 }
   0x8   :  { %p1374_p2 = pnand %p1372_p1, %p1369_p0 }
   0xa   :  { %1377 = shalt.err (!%p1374_p2)
}
   0xb   :  { %s1378_s30 = scalar_lea.vmem %s34_s22, 8192  ;;  %p1383_p4 = scmp.lt.s32.totalorder %s34_s22, %s34_s22 }
   0xc   :  { %p1379_p3 = scmp.ne.s32.totalorder %s34_s22, %s1378_s30  ;;  %p1384_p5 = scmp.lt.s32.totalorder %s1378_s30, %s1378_s30 }
   0xe   :  { %p1385_p6 = por %p1384_p5, %p1383_p4 }
  0x10   :  { %p1386_p7 = pnand %p1385_p6, %p1379_p3 }
  0x12   :  { %1389 = shalt.err (!%p1386_p7)
}
  0x13   :  { %s1487_s7 = smov 64   ;;  %s1488_s8 = smov 4  }
  0x14   :  { %39 = dma.hbm_to_vmem [thread:$0]  %s1642_s1, 8192, %s34_s22, [#allocation7], %s1487_s7, %s1487_s7, %s1488_s8  }
  0x15   :  { %s1489_s11 = smov [#allocation3]   ;;  %s1390_s15 = scalar_lea.hbm %s1641_s0, 128 }
  0x16   :  { %s21_s12 = sshll.u32 %s1489_s11, 4  ;;  %p1391_p8 = scmp.ne.s32.totalorder %s1641_s0, %s1390_s15  ;;  %s22_s12 = int_to_ptr.vmem [resolvable:$true] %s21_s12 }
  0x17   :  { %p1394_p9 = scmp.lt.u32.totalorder %s1390_s15, %s1641_s0 }
  0x19   :  { %p1396_p10 = pnand %p1394_p9, %p1391_p8 }
  0x1b   :  { %1399 = shalt.err (!%p1396_p10)
}
  0x1c   :  { %s1400_s20 = scalar_lea.vmem %s22_s12, 128  ;;  %s1404_s1 = scalar_lea.vmem %s22_s12, 1024 }
  0x1d   :  { %p1401_p11 = scmp.ne.s32.totalorder %s22_s12, %s1400_s20  ;;  %p1405_p12 = scmp.lt.s32.totalorder %s22_s12, %s22_s12 }
  0x1e   :  { %p1406_p13 = scmp.lt.s32.totalorder %s1404_s1, %s1400_s20 }
  0x20   :  { %p1407_p0 = por %p1406_p13, %p1405_p12 }
  0x22   :  { %p1408_p1 = pnand %p1407_p0, %p1401_p11 }
  0x24   :  { %1411 = shalt.err (!%p1408_p1)
}
  0x25   :  { %s1490_s21 = smov 128   ;;  %s1491_s22 = smov 8  }
  0x26   :  { %27 = dma.hbm_to_vmem [thread:$0]  %s1641_s0, 128, %s22_s12, [#allocation4], %s1490_s21, %s1490_s21, %s1491_s22  }
  0x27   :  { %s1492_s25 = smov [#allocation8]   ;;  %s1412_s29 = scalar_lea.hbm %s1644_s3, 1024 }
  0x28   :  { %s47_s26 = sshll.u32 %s1492_s25, 4  ;;  %p1413_p2 = scmp.ne.s32.totalorder %s1644_s3, %s1412_s29  ;;  %s48_s26 = int_to_ptr.vmem [resolvable:$true] %s47_s26 }
  0x29   :  { %p1416_p3 = scmp.lt.u32.totalorder %s1412_s29, %s1644_s3 }
  0x2b   :  { %p1418_p4 = pnand %p1416_p3, %p1413_p2 }
  0x2d   :  { %1421 = shalt.err (!%p1418_p4)
}
  0x2e   :  { %s1422_s13 = scalar_lea.vmem %s48_s26, 1024  ;;  %p1427_p6 = scmp.lt.s32.totalorder %s48_s26, %s48_s26 }
  0x2f   :  { %p1423_p5 = scmp.ne.s32.totalorder %s48_s26, %s1422_s13  ;;  %p1428_p7 = scmp.lt.s32.totalorder %s1422_s13, %s1422_s13 }
  0x31   :  { %p1429_p8 = por %p1428_p7, %p1427_p6 }
  0x33   :  { %p1430_p9 = pnand %p1429_p8, %p1423_p5 }
  0x35   :  { %1433 = shalt.err (!%p1430_p9)
}
  0x36   :  { %53 = dma.hbm_to_vmem [thread:$0]  %s1644_s3, 1024, %s48_s26, [#allocation7], %s1487_s7, %s1487_s7, %s1488_s8  }
  0x37   :  { %1478 = dma.done.wait [#allocation4], 1024  }
  0x38   :  { %1479 = vsyncadd [#allocation4], 4294966272 }
  0x39   :  { %1480 = dma.done.wait [#allocation7], 9216  }
  0x3a   :  { %1481 = vsyncadd [#allocation7], 4294958080  ;;  %v1284_v0 = vld [vmem:[#allocation6 + $0x40] sm:$0xff]   ;;  %v1288_v4 = vld [vmem:[#allocation6 + $0x48] sm:$0xff]   ;;  %v1493_v25 = vmov 1966171168   ;;  %v229_v27 = vlaneseq }
  0x3b   :  { %v1285_v1 = vld [vmem:[#allocation6 + $0xc0] sm:$0xff]   ;;  %1153 = vmatprep.subr.bf16.mxu0 %v1284_v0  ;;  %v1289_v5 = vld [vmem:[#allocation6 + $0xc8] sm:$0xff]   ;;  %v1292_v8 = vld [vmem:[#allocation6 + $0x50] sm:$0xff]   ;;  %v227_v26 = vunpack.c.l.s4 %v1493_v25  ;;  %vm1495_vm0 = vmmov 0  }
  0x3c   :  { %v1286_v2 = vld [vmem:[#allocation6] sm:$0xff]   ;;  %1175 = vmatprep.subr.bf16.mxu1 %v1285_v1  ;;  %v1290_v6 = vld [vmem:[#allocation6 + $0x8] sm:$0xff]   ;;  %v1293_v9 = vld [vmem:[#allocation6 + $0xd0] sm:$0xff]   ;;  %v230_v33 = vshrl.u32 %v229_v27, 7 }
  0x3d   :  { %v1287_v3 = vld [vmem:[#allocation6 + $0x80] sm:$0xff]   ;;  %1154 = vmatpush3.bf16.msra.mxu0 %v1286_v2  ;;  %v1291_v7 = vld [vmem:[#allocation6 + $0x88] sm:$0xff]   ;;  %v1294_v10 = vld [vmem:[#allocation6 + $0x10] sm:$0xff]   ;;  %v228_v32 = vunpack.c.0.s8 %v227_v26 }
  0x3e   :  { %1176 = vmatpush3.bf16.msra.mxu1 %v1287_v3  ;;  %1155 = vmatprep.subr.bf16.mxu0 %v1288_v4  ;;  %v1295_v11 = vld [vmem:[#allocation6 + $0x90] sm:$0xff]   ;;  %v1296_v12 = vld [vmem:[#allocation6 + $0x58] sm:$0xff]   ;;  %v1300_v16 = vld [vmem:[#allocation6 + $0x60] sm:$0xff]  }
  0x3f   :  { %1177 = vmatprep.subr.bf16.mxu1 %v1289_v5  ;;  %v1297_v13 = vld [vmem:[#allocation6 + $0xd8] sm:$0xff]   ;;  %v1301_v17 = vld [vmem:[#allocation6 + $0xe0] sm:$0xff]   ;;  %v1304_v20 = vld [vmem:[#allocation6 + $0x68] sm:$0xff]   ;;  %v1577_v37 = vsub.s32 %v228_v32, %v230_v33 }
  0x40   :  { %v1298_v14 = vld [vmem:[#allocation6 + $0x18] sm:$0xff]   ;;  %v1302_v18 = vld [vmem:[#allocation6 + $0x20] sm:$0xff]   ;;  %v1305_v21 = vld [vmem:[#allocation6 + $0xe8] sm:$0xff]  }
  0x41   :  { %1156 = vmatpush3.bf16.msra.mxu0 %v1290_v6  ;;  %v1299_v15 = vld [vmem:[#allocation6 + $0x98] sm:$0xff]   ;;  %v1303_v19 = vld [vmem:[#allocation6 + $0xa0] sm:$0xff]   ;;  %v1306_v22 = vld [vmem:[#allocation6 + $0x28] sm:$0xff]  }
  0x42   :  { %1178 = vmatpush3.bf16.msra.mxu1 %v1291_v7  ;;  %1157 = vmatprep.subr.bf16.mxu0 %v1292_v8  ;;  %v1307_v23 = vld [vmem:[#allocation6 + $0xa8] sm:$0xff]   ;;  %v1308_v24 = vld [vmem:[#allocation6 + $0x70] sm:$0xff]   ;;  %v1312_v31 = vld [vmem:[#allocation6 + $0x78] sm:$0xff]  }
  0x43   :  { %1179 = vmatprep.subr.bf16.mxu1 %v1293_v9  ;;  %v1309_v28 = vld [vmem:[#allocation6 + $0xf0] sm:$0xff]   ;;  %v1313_v34 = vld [vmem:[#allocation6 + $0xf8] sm:$0xff]   ;;  %v1316_v38 = vld [vmem:[#allocation3] ss:$8 sps:$4 sm:$0xff]  }
  0x44   :  { %v1310_v29 = vld [vmem:[#allocation6 + $0x30] sm:$0xff]   ;;  %v1314_v35 = vld [vmem:[#allocation6 + $0x38] sm:$0xff]   ;;  %v1318_v39 = vld [vmem:[#allocation3 + $0x4] ss:$8 sps:$4 sm:$0xff]   ;;  %v232_v45 = vrot.slane %v1316_v38, %v1577_v37 }
  0x45   :  { %1158 = vmatpush3.bf16.msra.mxu0 %v1294_v10  ;;  %v1311_v30 = vld [vmem:[#allocation6 + $0xb0] sm:$0xff]   ;;  %v1315_v36 = vld [vmem:[#allocation6 + $0xb8] sm:$0xff]   ;;  %v1322_v42 = vld [vmem:[#allocation3 + $0x20] ss:$8 sps:$4 sm:$0xff]   ;;  %v1582_v48 = vrot.slane %v1318_v39, %v1577_v37 }
  0x46   :  { %1180 = vmatpush3.bf16.msra.mxu1 %v1295_v11  ;;  %1159 = vmatprep.subr.bf16.mxu0 %v1296_v12  ;;  %v1319_v40 = vld [vmem:[#allocation3 + $0x10] ss:$8 sps:$4 sm:$0xff]   ;;  %v1321_v41 = vld [vmem:[#allocation3 + $0x14] ss:$8 sps:$4 sm:$0xff]   ;;  %v1324_v43 = vld [vmem:[#allocation3 + $0x24] ss:$8 sps:$4 sm:$0xff]   ;;  %v260_v50 = vrot.slane %v1322_v42, %v1577_v37 }
  0x47   :  { %1181 = vmatprep.subr.bf16.mxu1 %v1297_v13  ;;  %v1325_v44 = vld [vmem:[#allocation3 + $0x30] ss:$8 sps:$4 sm:$0xff]   ;;  %v1327_v46 = vld [vmem:[#allocation3 + $0x34] ss:$8 sps:$4 sm:$0xff]   ;;  %v246_v47 = vrot.slane %v1319_v40, %v1577_v37  ;;  %v1585_v49 = vrot.slane %v1321_v41, %v1577_v37  ;;  %v1328_v52 = vld [vmem:[#allocation6 + $0x140] sm:$0xff]   ;;  %v1590_v53 = vrot.slane %v1324_v43, %v1577_v37 }
  0x48   :  { %v274_v51 = vrot.slane %v1325_v44, %v1577_v37  ;;  %v1329_v56 = vld [vmem:[#allocation6 + $0x1c0] sm:$0xff]   ;;  %v1593_v57 = vrot.slane %v1327_v46, %v1577_v37  ;;  %v1332_v10 = vld [vmem:[#allocation6 + $0x148] sm:$0xff]   ;;  %v1352_v32 = vld [vmem:[#allocation6 + $0x170] sm:$0xff]  }
  0x49   :  { %1160 = vmatpush3.bf16.msra.mxu0 %v1298_v14  ;;  %v283_v54 = vcombine.high %v232_v45, %v246_v47  ;;  %v282_v55 = vcombine.low %v232_v45, %v246_v47  ;;  %v285_v58 = vcombine.high %v1582_v48, %v1585_v49  ;;  %v1330_v2 = vld [vmem:[#allocation6 + $0x100] sm:$0xff]   ;;  %v1333_v11 = vld [vmem:[#allocation6 + $0x1c8] sm:$0xff]   ;;  %v1353_v33 = vld [vmem:[#allocation6 + $0x1f0] sm:$0xff]  }
  0x4a   :  { %1182 = vmatpush3.bf16.msra.mxu1 %v1299_v15  ;;  %1161 = vmatprep.subr.bf16.mxu0 %v1300_v16  ;;  %v287_v59 = vcombine.high %v260_v50, %v274_v51  ;;  %v286_v60 = vcombine.low %v260_v50, %v274_v51  ;;  %v289_v63 = vcombine.high %v1590_v53, %v1593_v57  ;;  %v1331_v4 = vld [vmem:[#allocation6 + $0x180] sm:$0xff]   ;;  %v1334_v12 = vld [vmem:[#allocation6 + $0x108] sm:$0xff]   ;;  %v1336_v16 = vld [vmem:[#allocation6 + $0x150] sm:$0xff]  }
  0x4b   :  { %1183 = vmatprep.subr.bf16.mxu1 %v1301_v17  ;;  %v310_v61 = vrot.slane %v283_v54, %v1577_v37  ;;  %v296_v62 = vrot.slane %v282_v55, %v1577_v37  ;;  %v317_v3 = vrot.slane %v285_v58, %v1577_v37  ;;  %v1335_v15 = vld [vmem:[#allocation6 + $0x188] sm:$0xff]   ;;  %v1337_v17 = vld [vmem:[#allocation6 + $0x1d0] sm:$0xff]   ;;  %v1345_v25 = vld [vmem:[#allocation6 + $0x1e0] sm:$0xff]   ;;  %v288_v38 = vcombine.low %v1590_v53, %v1593_v57 }
  0x4c   :  { %v338_v0 = vrot.slane %v287_v59, %v1577_v37  ;;  %v324_v1 = vrot.slane %v286_v60, %v1577_v37  ;;  %v345_v5 = vrot.slane %v289_v63, %v1577_v37  ;;  %v1346_v26 = vld [vmem:[#allocation6 + $0x120] sm:$0xff]   ;;  %v1356_v39 = vld [vmem:[#allocation6 + $0x178] sm:$0xff]   ;;  %v1362_v50 = vld [vmem:[#allocation8 + $0x10] sm:$0xff]  }
  0x4d   :  { %1162 = vmatpush3.bf16.msra.mxu0 %v1302_v18  ;;  %v1338_v18 = vld [vmem:[#allocation6 + $0x110] sm:$0xff]   ;;  %v1347_v27 = vld [vmem:[#allocation6 + $0x1a0] sm:$0xff]   ;;  %v1357_v40 = vld [vmem:[#allocation6 + $0x1f8] sm:$0xff]   ;;  %v331_v44 = vrot.slane %v288_v38, %v1577_v37 }
  0x4e   :  { %1184 = vmatpush3.bf16.msra.mxu1 %v1303_v19  ;;  %1163 = vmatprep.subr.bf16.mxu0 %v1304_v20  ;;  %v350_v6 = vcombine.low %v310_v61, %v338_v0  ;;  %v351_v7 = vcombine.high %v310_v61, %v338_v0  ;;  %v346_v8 = vcombine.low %v296_v62, %v324_v1  ;;  %v1339_v19 = vld [vmem:[#allocation6 + $0x190] sm:$0xff]   ;;  %v1340_v20 = vld [vmem:[#allocation6 + $0x158] sm:$0xff]   ;;  %v1360_v47 = vld [vmem:[#allocation8] sm:$0xff]  }
  0x4f   :  { %1185 = vmatprep.subr.bf16.mxu1 %v1305_v21  ;;  %v347_v9 = vcombine.high %v296_v62, %v324_v1  ;;  %v352_v13 = vcombine.low %v317_v3, %v345_v5  ;;  %v353_v14 = vcombine.high %v317_v3, %v345_v5  ;;  %v1341_v21 = vld [vmem:[#allocation6 + $0x1d8] sm:$0xff]   ;;  %v1364_v51 = vld [vmem:[#allocation8 + $0x20] sm:$0xff]   ;;  %v1366_v53 = vld [vmem:[#allocation8 + $0x30] sm:$0xff]  }
  0x50   :  { %778 = vmatprep.mubr.bf16.mxu0 %v350_v6  ;;  %819 = vmatprep.mubr.bf16.mxu1 %v351_v7  ;;  %v1358_v41 = vld [vmem:[#allocation6 + $0x138] sm:$0xff]  }
  0x51   :  { %1164 = vmatpush3.bf16.msra.mxu0 %v1306_v22  ;;  %v1342_v22 = vld [vmem:[#allocation6 + $0x118] sm:$0xff]  }
  0x52   :  { %1186 = vmatpush3.bf16.msra.mxu1 %v1307_v23  ;;  %1165 = vmatprep.subr.bf16.mxu0 %v1308_v24  ;;  %v1343_v23 = vld [vmem:[#allocation6 + $0x198] sm:$0xff]   ;;  %v1344_v24 = vld [vmem:[#allocation6 + $0x160] sm:$0xff]  }
  0x53   :  { %1187 = vmatprep.subr.bf16.mxu1 %v1309_v28  ;;  %v1348_v28 = vld [vmem:[#allocation6 + $0x168] sm:$0xff]   ;;  %v1359_v42 = vld [vmem:[#allocation6 + $0x1b8] sm:$0xff]  }
  0x54   :  { %v1367_v54 = vld [vmem:[#allocation8 + $0x38] sm:$0xff]  }
  0x55   :  { %1166 = vmatpush3.bf16.msra.mxu0 %v1310_v29  ;;  %v1349_v29 = vld [vmem:[#allocation6 + $0x1e8] sm:$0xff]  }
  0x56   :  { %1188 = vmatpush3.bf16.msra.mxu1 %v1311_v30  ;;  %1167 = vmatprep.subr.bf16.mxu0 %v1312_v31  ;;  %v1350_v30 = vld [vmem:[#allocation6 + $0x128] sm:$0xff]  }
  0x57   :  { %1189 = vmatprep.subr.bf16.mxu1 %v1313_v34  ;;  %v1351_v31 = vld [vmem:[#allocation6 + $0x1a8] sm:$0xff]   ;;  %v1354_v34 = vld [vmem:[#allocation6 + $0x130] sm:$0xff]  }
  0x59   :  { %1168 = vmatpush3.bf16.msra.mxu0 %v1314_v35  ;;  %v1355_v35 = vld [vmem:[#allocation6 + $0x1b0] sm:$0xff]  }
  0x5a   :  { %1190 = vmatpush3.bf16.msra.mxu1 %v1315_v36  ;;  %1197 = vmatprep.subr.bf16.mxu0 %v1328_v52  ;;  %v284_v36 = vcombine.low %v1582_v48, %v1585_v49  ;;  %v1494_v48 = vmov 0.0   ;;  %v1361_v49 = vld [vmem:[#allocation8 + $0x8] sm:$0xff]  }
  0x5b   :  { %1219 = vmatprep.subr.bf16.mxu1 %v1329_v56  ;;  %v1365_v52 = vld [vmem:[#allocation8 + $0x28] sm:$0xff]  }
  0x5c   :  { %779 = vmatmul.mubr.bf16.vlgmr.msra.gmra.mrb[0].mxu0 %v346_v8  ;;  %v303_v43 = vrot.slane %v284_v36, %v1577_v37  ;;  %v1363_v37 = vld [vmem:[#allocation8 + $0x18] sm:$0xff]  }
  0x5d   :  { %820 = vmatmul.mubr.bf16.vlgmr.msra.gmra.mrb[0].mxu1 %v347_v9  ;;  %1198 = vmatpush3.bf16.msra.mxu0 %v1330_v2 }
  0x5e   :  { %1220 = vmatpush3.bf16.msra.mxu1 %v1331_v4  ;;  %1199 = vmatprep.subr.bf16.mxu0 %v1332_v10  ;;  %v348_v45 = vcombine.low %v303_v43, %v331_v44  ;;  %v349_v46 = vcombine.high %v303_v43, %v331_v44 }
  0x5f   :  { %1221 = vmatprep.subr.bf16.mxu1 %v1333_v11  ;;  %860 = vmatprep.mubr.bf16.mxu0 %v352_v13 }
  0x60   :  { %901 = vmatprep.mubr.bf16.mxu1 %v353_v14 }
  0x61   :  { %1200 = vmatpush3.bf16.msra.mxu0 %v1334_v12 }
  0x62   :  { %1222 = vmatpush3.bf16.msra.mxu1 %v1335_v15  ;;  %1201 = vmatprep.subr.bf16.mxu0 %v1336_v16 }
  0x63   :  { %1223 = vmatprep.subr.bf16.mxu1 %v1337_v17 }
  0x65   :  { %1202 = vmatpush3.bf16.msra.mxu0 %v1338_v18  ;;  %v1143_v18 = vld [vmem:[%s1643_s2] ss:$0 sm:$0xff] }
  0x66   :  { %1224 = vmatpush3.bf16.msra.mxu1 %v1339_v19  ;;  %1203 = vmatprep.subr.bf16.mxu0 %v1340_v20 }
  0x67   :  { %1225 = vmatprep.subr.bf16.mxu1 %v1341_v21 }
  0x69   :  { %1204 = vmatpush3.bf16.msra.mxu0 %v1342_v22 }
  0x6a   :  { %1226 = vmatpush3.bf16.msra.mxu1 %v1343_v23  ;;  %1205 = vmatprep.subr.bf16.mxu0 %v1344_v24 }
  0x6b   :  { %1227 = vmatprep.subr.bf16.mxu1 %v1345_v25  ;;  %v1144_v25 = vld [vmem:[%s1645_s4] ss:$0 sm:$0xff] }
  0x6d   :  { %1206 = vmatpush3.bf16.msra.mxu0 %v1346_v26 }
  0x6e   :  { %1228 = vmatpush3.bf16.msra.mxu1 %v1347_v27  ;;  %1207 = vmatprep.subr.bf16.mxu0 %v1348_v28 }
  0x6f   :  { %1229 = vmatprep.subr.bf16.mxu1 %v1349_v29 }
  0x71   :  { %1208 = vmatpush3.bf16.msra.mxu0 %v1350_v30 }
  0x72   :  { %1230 = vmatpush3.bf16.msra.mxu1 %v1351_v31  ;;  %1209 = vmatprep.subr.bf16.mxu0 %v1352_v32 }
  0x73   :  { %1231 = vmatprep.subr.bf16.mxu1 %v1353_v33 }
  0x75   :  { %1210 = vmatpush3.bf16.msra.mxu0 %v1354_v34 }
  0x76   :  { %1232 = vmatpush3.bf16.msra.mxu1 %v1355_v35  ;;  %1211 = vmatprep.subr.bf16.mxu0 %v1356_v39 }
  0x77   :  { %1233 = vmatprep.subr.bf16.mxu1 %v1357_v40 }
  0x79   :  { %1212 = vmatpush3.bf16.msra.mxu0 %v1358_v41 }
  0x7a   :  { %1234 = vmatpush3.bf16.msra.mxu1 %v1359_v42  ;;  %1250 = vmatprep.subr.bf16.mxu0 %v1494_v48 }
  0x7c   :  { %861 = vmatmul.mubr.bf16.vlgmr.msra.gmra.mrb[4].mxu0 %v348_v45 }
  0x7d   :  { %902 = vmatmul.mubr.bf16.vlgmr.msra.gmra.mrb[4].mxu1 %v349_v46  ;;  %1251 = vmatpush3.bf16.msra.mxu0 %v1360_v47 }
  0x7e   :  { %1252 = vmatprep.subr.bf16.mxu0 %v1494_v48  ;;  %1266 = vmatprep.mubr.msk.bf16.mxu0 %vm1495_vm0, %v1494_v48 }
  0x81   :  { %1253 = vmatpush3.bf16.msra.mxu0 %v1361_v49 }
  0x82   :  { %1254 = vmatprep.subr.bf16.mxu0 %v1494_v48 }
  0x85   :  { %1255 = vmatpush3.bf16.msra.mxu0 %v1362_v50 }
  0x86   :  { %1256 = vmatprep.subr.bf16.mxu0 %v1494_v48 }
  0x89   :  { %1257 = vmatpush3.bf16.msra.mxu0 %v1363_v37 }
  0x8a   :  { %1258 = vmatprep.subr.bf16.mxu0 %v1494_v48 }
  0x8d   :  { %1259 = vmatpush3.bf16.msra.mxu0 %v1364_v51 }
  0x8e   :  { %1260 = vmatprep.subr.bf16.mxu0 %v1494_v48 }
  0x91   :  { %1261 = vmatpush3.bf16.msra.mxu0 %v1365_v52 }
  0x92   :  { %1262 = vmatprep.subr.bf16.mxu0 %v1494_v48 }
  0x95   :  { %1263 = vmatpush3.bf16.msra.mxu0 %v1366_v53 }
  0x96   :  { %1264 = vmatprep.subr.bf16.mxu0 %v1494_v48 }
  0x99   :  { %1265 = vmatpush3.bf16.msra.mxu0 %v1367_v54 }
 0x12f   :  { %v1169_v55 = vpop.f32.mrb[0].mxu0 }
 0x130   :  { %v1191_v56 = vpop.f32.mrb[0].mxu1  ;;  %v1170_v57 = vpop.f32.mrb[1].mxu0 }
 0x131   :  { %v1192_v58 = vpop.f32.mrb[1].mxu1  ;;  %v1171_v59 = vadd.f32 %v1170_v57, %v1169_v55  ;;  %v1172_v61 = vpop.f32.mrb[2].mxu0 }
 0x132   :  { %v1193_v60 = vadd.f32 %v1192_v58, %v1191_v56  ;;  %v1194_v62 = vpop.f32.mrb[2].mxu1  ;;  %v1173_v63 = vpop.f32.mrb[3].mxu0 }
 0x133   :  { %v1195_v0 = vpop.f32.mrb[3].mxu1  ;;  %v1174_v2 = vadd.f32 %v1173_v63, %v1172_v61 }
 0x134   :  { %v822_v1 = vadd.f32 %v1193_v60, %v1171_v59  ;;  %v1196_v3 = vadd.f32 %v1195_v0, %v1194_v62 }
 0x136   :  { %v825_v4 = vadd.f32 %v1196_v3, %v1174_v2 }
 0x14f   :  { %v1213_v5 = vpop.f32.mrb[4].mxu0 }
 0x150   :  { %v1235_v6 = vpop.f32.mrb[4].mxu1  ;;  %v1214_v7 = vpop.f32.mrb[5].mxu0 }
 0x151   :  { %v1236_v8 = vpop.f32.mrb[5].mxu1  ;;  %v1215_v9 = vadd.f32 %v1214_v7, %v1213_v5  ;;  %v1216_v11 = vpop.f32.mrb[6].mxu0 }
 0x152   :  { %v1237_v10 = vadd.f32 %v1236_v8, %v1235_v6  ;;  %v1238_v12 = vpop.f32.mrb[6].mxu1  ;;  %v1217_v13 = vpop.f32.mrb[7].mxu0 }
 0x153   :  { %v1239_v14 = vpop.f32.mrb[7].mxu1  ;;  %v863_v15 = vadd.f32 %v1215_v9, %v822_v1  ;;  %v1218_v16 = vadd.f32 %v1217_v13, %v1216_v11 }
 0x154   :  { %v1240_v17 = vadd.f32 %v1239_v14, %v1238_v12 }
 0x155   :  { %v904_v19 = vadd.f32 %v1237_v10, %v863_v15  ;;  %v866_v20 = vadd.f32 %v1218_v16, %v825_v4 }
 0x157   :  { %v926_v21 = vadd.f32 %v1143_v18, %v904_v19  ;;  %v907_v22 = vadd.f32 %v1240_v17, %v866_v20 }
 0x159   :  { %928 = vst [vmem:[#allocation9] sm:$0xff] %v926_v21  ;;  %v927_v23 = vadd.f32 %v1143_v18, %v907_v22 }
 0x15b   :  { %929 = vst [vmem:[#allocation9 + $0x8] sm:$0xff] %v927_v23  ;;  %v930_v24 = vpack.c.bf16 %v927_v23, %v926_v21 }
 0x15d   :  { %1267 = vmatmul.mubr.bf16.vlgmr.msra.gmra.mrb[8].mxu0 %v930_v24 }
 0x230   :  { %v1036_v26 = vpop.f32.mrb[8].mxu0 }
 0x231   :  { %v1037_v27 = vadd.f32 %v1144_v25, %v1036_v26  ;;  %v1268_v28 = vpop.f32.mrb[9].mxu0 }
 0x232   :  { %v1039_v29 = vpop.f32.mrb[10].mxu0 }
 0x233   :  { %1043 = vst [vmem:[#allocation10] sm:$0xff] %v1037_v27  ;;  %v1040_v30 = vadd.f32 %v1144_v25, %v1039_v29  ;;  %v1269_v31 = vpop.f32.mrb[11].mxu0 }
 0x235   :  { %1044 = vst [vmem:[#allocation10 + $0x8] sm:$0xff] %v1040_v30 }
 0x236   :  { %1049 = vsyncadd [#allocation5], 224  ;;  %s1496_s2 = smov [#allocation9]  }
 0x237   :  { %s1050_s15 = sshll.u32 %s1496_s2, 4  ;;  %s1051_s15 = int_to_ptr.vmem [resolvable:$true] %s1050_s15 }
 0x238   :  { %s1434_s16 = scalar_lea.vmem %s1051_s15, 32  ;;  %s1438_s17 = scalar_lea.vmem %s1051_s15, 256 }
 0x239   :  { %p1435_p10 = scmp.ne.s32.totalorder %s1051_s15, %s1434_s16  ;;  %p1439_p11 = scmp.lt.s32.totalorder %s1051_s15, %s1051_s15 }
 0x23a   :  { %p1440_p12 = scmp.lt.s32.totalorder %s1438_s17, %s1434_s16 }
 0x23c   :  { %p1441_p13 = por %p1440_p12, %p1439_p11 }
 0x23e   :  { %p1442_p0 = pnand %p1441_p13, %p1435_p10 }
 0x240   :  { %1445 = shalt.err (!%p1442_p0)
}
 0x241   :  { %s1446_s19 = scalar_lea.hbm %s1646_s5, 32 }
 0x242   :  { %p1447_p1 = scmp.ne.s32.totalorder %s1646_s5, %s1446_s19  ;;  %p1450_p2 = scmp.lt.u32.totalorder %s1446_s19, %s1646_s5 }
 0x244   :  { %p1452_p3 = pnand %p1450_p2, %p1447_p1 }
 0x246   :  { %1455 = shalt.err (!%p1452_p3)
}
 0x247   :  { %s1497_s23 = smov 32   ;;  %s1498_s24 = smov 2  }
 0x248   :  { %1056 = dma.vmem_to_hbm [thread:$0]  %s1051_s15, 32, %s1646_s5, [#allocation5], %s1497_s23, %s1497_s23, %s1498_s24  }
 0x249   :  { %1061 = vsyncadd [#allocation11], 224  ;;  %s1499_s27 = smov [#allocation10]  }
 0x24a   :  { %s1062_s28 = sshll.u32 %s1499_s27, 4  ;;  %s1063_s28 = int_to_ptr.vmem [resolvable:$true] %s1062_s28 }
 0x24b   :  { %s1456_s29 = scalar_lea.vmem %s1063_s28, 32  ;;  %s1460_s30 = scalar_lea.vmem %s1063_s28, 256 }
 0x24c   :  { %p1457_p4 = scmp.ne.s32.totalorder %s1063_s28, %s1456_s29  ;;  %p1461_p5 = scmp.lt.s32.totalorder %s1063_s28, %s1063_s28 }
 0x24d   :  { %p1462_p6 = scmp.lt.s32.totalorder %s1460_s30, %s1456_s29 }
 0x24f   :  { %p1463_p7 = por %p1462_p6, %p1461_p5 }
 0x251   :  { %p1464_p8 = pnand %p1463_p7, %p1457_p4 }
 0x253   :  { %1467 = shalt.err (!%p1464_p8)
}
 0x254   :  { %s1468_s11 = scalar_lea.hbm %s1647_s6, 32 }
 0x255   :  { %p1469_p9 = scmp.ne.s32.totalorder %s1647_s6, %s1468_s11  ;;  %p1472_p10 = scmp.lt.u32.totalorder %s1468_s11, %s1647_s6 }
 0x257   :  { %p1474_p11 = pnand %p1472_p10, %p1469_p9 }
 0x259   :  { %1477 = shalt.err (!%p1474_p11)
}
 0x25a   :  { %1068 = dma.vmem_to_hbm [thread:$0]  %s1063_s28, 32, %s1647_s6, [#allocation11], %s1497_s23, %s1497_s23, %s1498_s24  }
 0x25b   :  { %1482 = dma.done.wait [#allocation5], 256  }
 0x25c   :  { %1483 = vsyncadd [#allocation5], 4294967040 }
 0x25d   :  { %1484 = dma.done.wait [#allocation11], 256  }
 0x25e   :  { %1485 = vsyncadd [#allocation11], 4294967040 }
 0x25f   :  { %1075 = vsyncpa [#allocation4], 1 }
 0x260   :  { %1076 = vsyncpa [#allocation7], 1 }
 0x261   :  { %1077 = vsyncpa [#allocation5], 1 }
 0x262   :  { %1078 = vsyncpa [#allocation11], 1 }

</bundles_post_ra>
